<compile_context>
chip_gen: v6e
topology: v6e:2x2x1
jax: 0.10.0
libtpu: 0.0.40
codegen_flags: <defaults>
</compile_context>

<pallas_src>
import jax
import jax.numpy as jnp
from jax.experimental import pallas as pl
from jax.experimental.pallas import tpu as pltpu

_EPS = 1e-12  # F.normalize default eps


def _at_loss_kernel(fs_ref, ft_ref, out_ref):
    """Batch-tile attention-map squared-diff partial sum.

    fs_ref:  (TB, Cs, HW)  student features (one batch tile)
    ft_ref:  (TB, Ct, HW)  teacher features (one batch tile)
    out_ref: (1, 8, 128)   per-step partial sum, replicated across the tile
    """
    fs = fs_ref[...].astype(jnp.float32)
    ft = ft_ref[...].astype(jnp.float32)

    # at(f) = L2-normalize( mean_c(f^2) ) over the flattened spatial dim.
    # Channel axis sits on sublanes -> cheap XLU reduction; HW stays on lanes.
    a_s = jnp.mean(fs * fs, axis=1)                 # (TB, HW)
    a_t = jnp.mean(ft * ft, axis=1)                 # (TB, HW)

    ns = jnp.maximum(jnp.sqrt(jnp.sum(a_s * a_s, axis=-1, keepdims=True)), _EPS)
    nt = jnp.maximum(jnp.sqrt(jnp.sum(a_t * a_t, axis=-1, keepdims=True)), _EPS)

    # Exact reciprocal hoisted to one divide per (TB, 1) row, then a broadcast
    # multiply on the VPU (keeps bit-level parity with the pure-JAX reference).
    d = a_s * (1.0 / ns) - a_t * (1.0 / nt)         # (TB, HW)

    partial = jnp.sum(d * d)                        # scalar f32
    # Lane-dense, vreg-aligned unmasked store of the per-step partial sum.
    out_ref[...] = jnp.zeros_like(out_ref) + partial


def _adaptive_avg_pool2d(x, out_hw):
    """adaptive_avg_pool2d for the divisible case (kernel-size = H // out_hw)."""
    n, c, h, w = x.shape
    if h == out_hw and w == out_hw:
        return x
    # TODO(synk): general (non-divisible) adaptive pooling bins not implemented.
    assert h % out_hw == 0 and w % out_hw == 0, "only divisible adaptive pool supported"
    kh, kw = h // out_hw, w // out_hw
    x = x.reshape(n, c, out_hw, kh, out_hw, kw)
    return x.mean(axis=(3, 5))


def _vmem_config():
    """Per-generation VMEM budget derived from physical VMEM capacity."""
    try:
        # 128 MiB on v5e/v6e, 64 MiB per TensorCore on v7x.
        cap = int(pltpu.get_tpu_info().vmem_capacity_bytes)
    except Exception:
        cap = 64 << 20  # conservative fallback (smallest = v7x per-TC)
    vmem_limit = min(int(cap * 0.7), 96 << 20)
    # Double-buffered (student + teacher) input tiles take ~2/3 of the limit,
    # the remaining 1/3 is headroom for the tiny output + compiler internals.
    tile_budget = vmem_limit // 3
    return vmem_limit, tile_budget


def _pick_batch_tile(n, per_batch_bytes, tile_budget_bytes):
    """Largest divisor of n whose per-step input tile fits the budget."""
    tb_max = max(1, tile_budget_bytes // max(per_batch_bytes, 1))
    tb = 1
    for d in range(1, min(n, tb_max) + 1):
        if n % d == 0:
            tb = d
    return tb


def at_loss(g_s, g_t):
    """JAX/Pallas equivalent of At_loss.forward (p=2)."""
    s_h, t_h = g_s.shape[2], g_t.shape[2]
    # TODO(synk): fuse the adaptive pool into the kernel (do the kh x kw spatial
    # mean in VMEM) to avoid materializing the pooled intermediate in HBM.
    if s_h > t_h:
        g_s = _adaptive_avg_pool2d(g_s, t_h)
    elif s_h < t_h:
        g_t = _adaptive_avg_pool2d(g_t, s_h)

    n, cs, h, w = g_s.shape
    _, ct, _, _ = g_t.shape
    hw = h * w
    # Keep native dtype (bf16 halves HBM traffic); cast to f32 inside the kernel.
    fs = g_s.reshape(n, cs, hw)
    ft = g_t.reshape(n, ct, hw)

    vmem_limit, tile_budget = _vmem_config()
    per_batch_bytes = cs * hw * fs.dtype.itemsize + ct * hw * ft.dtype.itemsize
    tb = _pick_batch_tile(n, per_batch_bytes, tile_budget)
    steps = n // tb
    # TODO(synk): if a single batch element (C*HW) ever exceeds the VMEM budget,
    # add a trailing "arbitrary" channel grid axis with (TB, HW) scratch
    # accumulators and a pl.when(last-channel-step) normalize/diff epilogue.

    partials = pl.pallas_call(
        _at_loss_kernel,
        out_shape=jax.ShapeDtypeStruct((steps, 8, 128), jnp.float32),
        grid_spec=pltpu.PrefetchScalarGridSpec(
            num_scalar_prefetch=0,
            grid=(steps,),
            in_specs=[
                pl.BlockSpec((tb, cs, hw), lambda i: (i, 0, 0)),
                pl.BlockSpec((tb, ct, hw), lambda i: (i, 0, 0)),
            ],
            out_specs=pl.BlockSpec((1, 8, 128), lambda i: (i, 0, 0)),
        ),
        compiler_params=pltpu.CompilerParams(
            dimension_semantics=("parallel",),
            vmem_limit_bytes=vmem_limit,
        ),
    )(fs, ft)

    # .pow(2).mean() over the (N, H*W) difference tensor.
    return jnp.sum(partials[:, 0, 0]) / jnp.float32(n * hw)


def _at_loss_ref(g_s, g_t):
    """Pure-JAX reference (mirrors the PyTorch module)."""
    s_h, t_h = g_s.shape[2], g_t.shape[2]
    if s_h > t_h:
        g_s = _adaptive_avg_pool2d(g_s, t_h)
    elif s_h < t_h:
        g_t = _adaptive_avg_pool2d(g_t, s_h)

    def at(f):
        v = jnp.mean(f.astype(jnp.float32) ** 2, axis=1).reshape(f.shape[0], -1)
        nrm = jnp.maximum(jnp.linalg.norm(v, axis=1, keepdims=True), _EPS)
        return v / nrm

    d = at(g_s) - at(g_t)
    return jnp.mean(d ** 2)


if __name__ == "__main__":
    key = jax.random.PRNGKey(0)
    k1, k2 = jax.random.split(key)
    # student: (N=2, C=4, H=16, W=16); teacher: (N=2, C=8, H=16, W=16)
    g_s = jax.random.normal(k1, (2, 4, 16, 16), dtype=jnp.float32)
    g_t = jax.random.normal(k2, (2, 8, 16, 16), dtype=jnp.float32)

    out = at_loss(g_s, g_t)
    jax.block_until_ready(out)

    ref = _at_loss_ref(g_s, g_t)
    assert jnp.allclose(out, ref, rtol=1e-5, atol=1e-6), (out, ref)

    print("KERNEL_OK")
</pallas_src>

<mosaic_0001>
module attributes {stable_mosaic.version = 11 : i64} {
  func.func @_at_loss_kernel(%arg0: i32, %arg1: memref<2x4x256xf32, #tpu.memory_space<vmem>>, %arg2: memref<2x8x256xf32, #tpu.memory_space<vmem>>, %arg3: memref<1x8x128xf32, #tpu.memory_space<vmem>>) attributes {dimension_semantics = [#tpu.dimension_semantics<parallel>], iteration_bounds = array<i64: 1>, scalar_prefetch = 0 : i64, scratch_operands = 0 : i64, tpu.core_type = #tpu.core_type<tc>, window_params = [{transform_indices = @transform_0, window_bounds = array<i64: 2, 4, 256>}, {transform_indices = @transform_1, window_bounds = array<i64: 2, 8, 256>}, {transform_indices = @transform_2, window_bounds = array<i64: 1, 8, 128>}]} {
    %c0 = arith.constant 0 : index
    %c0_0 = arith.constant 0 : index
    %c0_1 = arith.constant 0 : index
    %0 = vector.load %arg1[%c0, %c0_0, %c0_1] : memref<2x4x256xf32, #tpu.memory_space<vmem>>, vector<2x4x256xf32>
    %c0_2 = arith.constant 0 : index
    %c0_3 = arith.constant 0 : index
    %c0_4 = arith.constant 0 : index
    %1 = vector.load %arg2[%c0_2, %c0_3, %c0_4] : memref<2x8x256xf32, #tpu.memory_space<vmem>>, vector<2x8x256xf32>
    %2 = arith.mulf %0, %0 : vector<2x4x256xf32>
    %cst = arith.constant dense<0.000000e+00> : vector<2x256xf32>
    %3 = vector.multi_reduction <add>, %2, %cst [1] : vector<2x4x256xf32> to vector<2x256xf32>
    %cst_5 = arith.constant 4.000000e+00 : f32
    %4 = vector.broadcast %cst_5 : f32 to vector<2x256xf32>
    %5 = arith.divf %3, %4 : vector<2x256xf32>
    %6 = arith.mulf %1, %1 : vector<2x8x256xf32>
    %cst_6 = arith.constant dense<0.000000e+00> : vector<2x256xf32>
    %7 = vector.multi_reduction <add>, %6, %cst_6 [1] : vector<2x8x256xf32> to vector<2x256xf32>
    %cst_7 = arith.constant 8.000000e+00 : f32
    %8 = vector.broadcast %cst_7 : f32 to vector<2x256xf32>
    %9 = arith.divf %7, %8 : vector<2x256xf32>
    %10 = arith.mulf %5, %5 : vector<2x256xf32>
    %cst_8 = arith.constant dense<0.000000e+00> : vector<2xf32>
    %11 = vector.multi_reduction <add>, %10, %cst_8 [1] : vector<2x256xf32> to vector<2xf32>
    %12 = vector.shape_cast %11 : vector<2xf32> to vector<2x1xf32>
    %13 = math.sqrt %12 : vector<2x1xf32>
    %cst_9 = arith.constant 9.99999996E-13 : f32
    %14 = vector.broadcast %cst_9 : f32 to vector<2x1xf32>
    %15 = arith.maximumf %13, %14 : vector<2x1xf32>
    %16 = arith.mulf %9, %9 : vector<2x256xf32>
    %cst_10 = arith.constant dense<0.000000e+00> : vector<2xf32>
    %17 = vector.multi_reduction <add>, %16, %cst_10 [1] : vector<2x256xf32> to vector<2xf32>
    %18 = vector.shape_cast %17 : vector<2xf32> to vector<2x1xf32>
    %19 = math.sqrt %18 : vector<2x1xf32>
    %cst_11 = arith.constant 9.99999996E-13 : f32
    %20 = vector.broadcast %cst_11 : f32 to vector<2x1xf32>
    %21 = arith.maximumf %19, %20 : vector<2x1xf32>
    %cst_12 = arith.constant 1.000000e+00 : f32
    %22 = vector.broadcast %cst_12 : f32 to vector<2x1xf32>
    %23 = arith.divf %22, %15 : vector<2x1xf32>
    %24 = vector.broadcast %23 : vector<2x1xf32> to vector<2x256xf32>
    %25 = arith.mulf %5, %24 : vector<2x256xf32>
    %cst_13 = arith.constant 1.000000e+00 : f32
    %26 = vector.broadcast %cst_13 : f32 to vector<2x1xf32>
    %27 = arith.divf %26, %21 : vector<2x1xf32>
    %28 = vector.broadcast %27 : vector<2x1xf32> to vector<2x256xf32>
    %29 = arith.mulf %9, %28 : vector<2x256xf32>
    %30 = arith.subf %25, %29 : vector<2x256xf32>
    %31 = arith.mulf %30, %30 : vector<2x256xf32>
    %32 = vector.shape_cast %31 : vector<2x256xf32> to vector<1x2x256xf32>
    %cst_14 = arith.constant dense<0.000000e+00> : vector<1xf32>
    %33 = vector.multi_reduction <add>, %32, %cst_14 [1, 2] : vector<1x2x256xf32> to vector<1xf32>
    %34 = vector.shape_cast %33 : vector<1xf32> to vector<1x1x1xf32>
    %35 = vector.extract %34[0, 0, 0] : f32 from vector<1x1x1xf32>
    %cst_15 = arith.constant 0.000000e+00 : f32
    %36 = vector.broadcast %cst_15 : f32 to vector<1x8x128xf32>
    %37 = vector.broadcast %35 : f32 to vector<1x8x128xf32>
    %38 = arith.addf %36, %37 : vector<1x8x128xf32>
    %c0_16 = arith.constant 0 : index
    %c0_17 = arith.constant 0 : index
    %c0_18 = arith.constant 0 : index
    %39 = vector.load %arg3[%c0_16, %c0_17, %c0_18] : memref<1x8x128xf32, #tpu.memory_space<vmem>>, vector<1x8x128xf32>
    tpu.vector_store %arg3[%c0_16, %c0_17, %c0_18], %38 {strides = array<i32>} : memref<1x8x128xf32, #tpu.memory_space<vmem>>, vector<1x8x128xf32>,
    return
  }
  func.func @transform_0(%arg0: i32) -> (i32, i32, i32) {
    %c0_i32 = arith.constant 0 : i32
    %c0_i32_0 = arith.constant 0 : i32
    %c0_i32_1 = arith.constant 0 : i32
    return %arg0, %c0_i32, %c0_i32_0 : i32, i32, i32
  }
  func.func @transform_1(%arg0: i32) -> (i32, i32, i32) {
    %c0_i32 = arith.constant 0 : i32
    %c0_i32_0 = arith.constant 0 : i32
    %c0_i32_1 = arith.constant 0 : i32
    return %arg0, %c0_i32, %c0_i32_0 : i32, i32, i32
  }
  func.func @transform_2(%arg0: i32) -> (i32, i32, i32) {
    %c0_i32 = arith.constant 0 : i32
    %c0_i32_0 = arith.constant 0 : i32
    %c0_i32_1 = arith.constant 0 : i32
    return %arg0, %c0_i32, %c0_i32_0 : i32, i32, i32
  }
}

</mosaic_0001>

<bundles_post_ra>
// kernel: tpu_custom_call.1
= control target key start
LH: loop header
LB: loop body
LE: loop exit
PB: predicated region body
PF: predicated region fallthrough
CT: control target
= control target key end

     0   :  { %7 = vsyncpa [#allocation3], 0  ;;  %s372_s0 = inlined_call_operand.hbm [shape: f32[2,4,256], index: 0, kind: input, shape index: {}]   ;;  %s373_s1 = inlined_call_operand.hbm [shape: f32[2,8,256], index: 1, kind: input, shape index: {}]   ;;  %s374_s2 = inlined_call_operand.hbm [shape: f32[1,8,128], index: 2, kind: output, shape index: {}]  }
   0x1   :  { %8 = vsyncpa [#allocation6], 0 }
   0x2   :  { %9 = vsyncpa [#allocation4], 0  ;;  %s325_s9 = smov [#allocation2]  }
   0x3   :  { %s15_s10 = sshll.u32 %s325_s9, 4  ;;  %s16_s10 = int_to_ptr.vmem [resolvable:$true] %s15_s10 }
   0x4   :  { %s267_s11 = scalar_lea.vmem %s16_s10, 256  ;;  %p272_p1 = scmp.lt.s32.totalorder %s16_s10, %s16_s10 }
   0x5   :  { %p268_p0 = scmp.ne.s32.totalorder %s16_s10, %s267_s11  ;;  %p273_p2 = scmp.lt.s32.totalorder %s267_s11, %s267_s11 }
   0x7   :  { %p274_p3 = por %p273_p2, %p272_p1 }
   0x9   :  { %p275_p4 = pnand %p274_p3, %p268_p0 }
   0xb   :  { %278 = shalt.err (!%p275_p4)
}
   0xc   :  { %s326_s12 = smov 128   ;;  %s327_s13 = smov 8  }
   0xd   :  { %21 = dma.hbm_to_vmem [thread:$0]  %s372_s0, 256, %s16_s10, [#allocation3], %s326_s12, %s326_s12, %s327_s13  }
   0xe   :  { %s328_s16 = smov [#allocation5]  }
   0xf   :  { %s27_s17 = sshll.u32 %s328_s16, 4  ;;  %s28_s17 = int_to_ptr.vmem [resolvable:$true] %s27_s17 }
  0x10   :  { %s287_s18 = scalar_lea.vmem %s28_s17, 512  ;;  %p292_p6 = scmp.lt.s32.totalorder %s28_s17, %s28_s17 }
  0x11   :  { %p288_p5 = scmp.ne.s32.totalorder %s28_s17, %s287_s18  ;;  %p293_p7 = scmp.lt.s32.totalorder %s287_s18, %s287_s18 }
  0x13   :  { %p294_p8 = por %p293_p7, %p292_p6 }
  0x15   :  { %p295_p9 = pnand %p294_p8, %p288_p5 }
  0x17   :  { %298 = shalt.err (!%p295_p9)
}
  0x18   :  { %s329_s19 = smov 256   ;;  %s330_s20 = smov 16  }
  0x19   :  { %33 = dma.hbm_to_vmem [thread:$0]  %s373_s1, 512, %s28_s17, [#allocation6], %s329_s19, %s329_s19, %s330_s20  }
  0x1a   :  { %319 = dma.done.wait [#allocation3], 256  }
  0x1b   :  { %320 = vsyncadd [#allocation3], 4294967040 }
  0x1c   :  { %321 = dma.done.wait [#allocation6], 512  }
  0x1d   :  { %322 = vsyncadd [#allocation6], 4294966784  ;;  %v40_v0 = vld [vmem:[#allocation2] sm:$0xff]  ;;  %v41_v1 = vld [vmem:[#allocation2 + $0x8] sm:$0xff]  ;;  %vm54_vm0 = vcmask 1043456   ;;  %vm129_vm1 = vcmask 1041409  }
  0x1e   :  { %v42_v2 = vld [vmem:[#allocation5] sm:$0xff]  ;;  %v46_v3 = vmul.f32 %v40_v0, %v40_v0  ;;  %v47_v4 = vmul.f32 %v41_v1, %v41_v1  ;;  %v43_v5 = vld [vmem:[#allocation5 + $0x8] sm:$0xff]  ;;  %v44_v6 = vld [vmem:[#allocation5 + $0x10] sm:$0xff]  ;;  %vm134_vm2 = vcmask 1041408   ;;  %s331_s0 = smov [#allocation7]  }
  0x1f   :  { %v45_v7 = vld [vmem:[#allocation5 + $0x18] sm:$0xff]  ;;  %v88_v8 = vmul.f32 %v42_v2, %v42_v2  ;;  %v89_v9 = vmul.f32 %v43_v5, %v43_v5  ;;  %v90_v10 = vmul.f32 %v44_v6, %v44_v6  ;;  %s232_s1 = sshll.u32 %s331_s0, 4  ;;  %s233_s1 = int_to_ptr.vmem [resolvable:$true] %s232_s1 }
  0x20   :  { %v91_v11 = vmul.f32 %v45_v7, %v45_v7  ;;  %v50_v12 = vcombine.high %v46_v3, %v46_v3  ;;  %v51_v13 = vcombine.high %v47_v4, %v47_v4  ;;  %v55_v14 = vsel %vm54_vm0, %v46_v3, 0.0  ;;  %s299_s24 = scalar_lea.vmem %s233_s1, 128  ;;  %p304_p11 = scmp.lt.s32.totalorder %s233_s1, %s233_s1 }
  0x21   :  { %v69_v15 = vsel %vm54_vm0, %v47_v4, 0.0  ;;  %v56_v16 = vrot.slane %v55_v14, 4  ;;  %v92_v18 = vrot.slane %v88_v8, 4  ;;  %v98_v19 = vrot.slane %v89_v9, 4  ;;  %p300_p10 = scmp.ne.s32.totalorder %s233_s1, %s299_s24  ;;  %p305_p12 = scmp.lt.s32.totalorder %s299_s24, %s299_s24 }
  0x22   :  { %v70_v17 = vrot.slane %v69_v15, 4  ;;  %v62_v20 = vsel %vm54_vm0, %v50_v12, 0.0  ;;  %v76_v21 = vsel %vm54_vm0, %v51_v13, 0.0  ;;  %v104_v22 = vrot.slane %v90_v10, 4 }
  0x23   :  { %v110_v23 = vrot.slane %v91_v11, 4  ;;  %v57_v24 = vadd.f32 %v56_v16, %v55_v14  ;;  %v63_v25 = vrot.slane %v62_v20, 4  ;;  %v77_v27 = vrot.slane %v76_v21, 4  ;;  %p306_p13 = por %p305_p12, %p304_p11 }
  0x24   :  { %v71_v26 = vadd.f32 %v70_v17, %v69_v15  ;;  %v93_v28 = vadd.f32 %v92_v18, %v88_v8  ;;  %v99_v29 = vadd.f32 %v98_v19, %v89_v9  ;;  %v105_v30 = vadd.f32 %v104_v22, %v90_v10 }
  0x25   :  { %v111_v31 = vadd.f32 %v110_v23, %v91_v11  ;;  %v58_v32 = vrot.slane %v57_v24, 2  ;;  %v64_v33 = vadd.f32 %v63_v25, %v62_v20  ;;  %v78_v35 = vadd.f32 %v77_v27, %v76_v21  ;;  %p307_p0 = pnand %p306_p13, %p300_p10 }
  0x26   :  { %v72_v34 = vrot.slane %v71_v26, 2  ;;  %v94_v36 = vrot.slane %v93_v28, 2  ;;  %v100_v37 = vrot.slane %v99_v29, 2  ;;  %v106_v38 = vrot.slane %v105_v30, 2 }
  0x27   :  { %v112_v39 = vrot.slane %v111_v31, 2  ;;  %v59_v40 = vadd.f32 %v58_v32, %v57_v24  ;;  %v65_v41 = vrot.slane %v64_v33, 2  ;;  %v79_v43 = vrot.slane %v78_v35, 2 }
  0x28   :  { %v73_v42 = vadd.f32 %v72_v34, %v71_v26  ;;  %v95_v44 = vadd.f32 %v94_v36, %v93_v28  ;;  %v101_v45 = vadd.f32 %v100_v37, %v99_v29  ;;  %v107_v46 = vadd.f32 %v106_v38, %v105_v30 }
  0x29   :  { %v113_v47 = vadd.f32 %v112_v39, %v111_v31  ;;  %v60_v48 = vrot.slane %v59_v40, 1  ;;  %v66_v49 = vadd.f32 %v65_v41, %v64_v33  ;;  %v80_v51 = vadd.f32 %v79_v43, %v78_v35 }
  0x2a   :  { %v74_v50 = vrot.slane %v73_v42, 1  ;;  %v96_v52 = vrot.slane %v95_v44, 1  ;;  %v102_v53 = vrot.slane %v101_v45, 1  ;;  %v108_v54 = vrot.slane %v107_v46, 1 }
  0x2b   :  { %v114_v55 = vrot.slane %v113_v47, 1  ;;  %v61_v56 = vadd.f32 %v60_v48, %v59_v40  ;;  %v67_v57 = vrot.slane %v66_v49, 1  ;;  %v81_v59 = vrot.slane %v80_v51, 1 }
  0x2c   :  { %v75_v58 = vadd.f32 %v74_v50, %v73_v42  ;;  %v97_v60 = vadd.f32 %v96_v52, %v95_v44  ;;  %v103_v61 = vadd.f32 %v102_v53, %v101_v45  ;;  %v109_v62 = vadd.f32 %v108_v54, %v107_v46 }
  0x2d   :  { %v115_v63 = vadd.f32 %v114_v55, %v113_v47  ;;  %v68_v0 = vadd.f32 %v67_v57, %v66_v49  ;;  %v82_v1 = vadd.f32 %v81_v59, %v80_v51  ;;  %v84_v2 = vmul.f32 0.25, %v61_v56 }
  0x2e   :  { %v86_v3 = vmul.f32 0.25, %v75_v58  ;;  %v117_v4 = vmul.f32 0.125, %v97_v60  ;;  %v118_v5 = vmul.f32 0.125, %v103_v61  ;;  %v119_v6 = vmul.f32 0.125, %v109_v62 }
  0x2f   :  { %v120_v7 = vmul.f32 0.125, %v115_v63  ;;  %v85_v8 = vmul.f32 0.25, %v68_v0  ;;  %v87_v9 = vmul.f32 0.25, %v82_v1  ;;  %v121_v10 = vmul.f32 %v84_v2, %v84_v2 }
  0x30   :  { %v123_v11 = vmul.f32 %v86_v3, %v86_v3  ;;  %v148_v12 = vmul.f32 %v117_v4, %v117_v4  ;;  %v149_v13 = vmul.f32 %v118_v5, %v118_v5  ;;  %v150_v14 = vmul.f32 %v119_v6, %v119_v6 }
  0x31   :  { %v151_v15 = vmul.f32 %v120_v7, %v120_v7  ;;  %v122_v16 = vmul.f32 %v85_v8, %v85_v8  ;;  %v124_v17 = vmul.f32 %v87_v9, %v87_v9 }
  0x32   :  { %v130_v18 = vsel %vm129_vm1, %v123_v11, %v121_v10  ;;  %v156_v20 = vsel %vm129_vm1, %v150_v14, %v148_v12 }
  0x33   :  { %v135_v19 = vsel %vm134_vm2, %v130_v18, 0.0  ;;  %v157_v21 = vsel %vm129_vm1, %v151_v15, %v149_v13  ;;  %v131_v22 = vsel %vm129_vm1, %v124_v17, %v122_v16  ;;  %v160_v24 = vsel %vm134_vm2, %v156_v20, 0.0 }
  0x34   :  { %v136_v23 = vsel %vm134_vm2, %v131_v22, 0.0  ;;  %v161_v25 = vsel %vm134_vm2, %v157_v21, 0.0 }
  0x35   :  { %v137_v26 = vadd.f32 %v136_v23, %v135_v19  ;;  %v162_v27 = vadd.f32 %v161_v25, %v160_v24 }
  0x37   :  { %138 = vadd.xlane.f32.xlu0 %v137_v26 }
  0x3b   :  { %163 = vadd.xlane.f32.xlu0 %v162_v27 }
  0xc0   :  { %v139_v28 = vpop.xlane.xlu0 %138 }
  0xc1   :  { %251 = vrsqrt.f32 %v139_v28  ;;  %vm142_vm3 = vcmp.eq.f32.partialorder %v139_v28, inf  ;;  %v145_v32 = vand.u32 2147483648, %v139_v28  ;;  %vm144_vm4 = vcmp.eq.f32.partialorder %v139_v28, 0.0 }
  0xc4   :  { %v164_v29 = vpop.xlane.xlu0 %163 }
  0xc5   :  { %253 = vrsqrt.f32 %v164_v29  ;;  %vm167_vm5 = vcmp.eq.f32.partialorder %v164_v29, inf  ;;  %v170_v38 = vand.u32 2147483648, %v164_v29  ;;  %vm169_vm6 = vcmp.eq.f32.partialorder %v164_v29, 0.0 }
  0xce   :  { %v252_v30 = vpop.eup %251 }
  0xcf   :  { %v141_v31 = vmul.f32 %v252_v30, %v139_v28 }
  0xd1   :  { %v143_v33 = vsel %vm142_vm3, %v139_v28, %v141_v31 }
  0xd2   :  { %v254_v34 = vpop.eup %253  ;;  %v146_v35 = vsel %vm144_vm4, %v145_v32, %v143_v33 }
  0xd3   :  { %v147_v36 = vmax.f32 %v146_v35, 1e-12  ;;  %v166_v37 = vmul.f32 %v254_v34, %v164_v29 }
  0xd5   :  { %255 = vrcp.f32 %v147_v36  ;;  %v168_v39 = vsel %vm167_vm5, %v164_v29, %v166_v37 }
  0xd6   :  { %v171_v40 = vsel %vm169_vm6, %v170_v38, %v168_v39 }
  0xd7   :  { %v172_v41 = vmax.f32 %v171_v40, 1e-12 }
  0xd9   :  { %257 = vrcp.f32 %v172_v41 }
  0xe2   :  { %v256_v42 = vpop.eup %255 }
  0xe3   :  { %v176_v43 = vrot.slane %v256_v42, 1  ;;  %v179_v48 = vmul.f32 %v256_v42, %v84_v2  ;;  %v180_v49 = vmul.f32 %v256_v42, %v85_v8 }
  0xe5   :  { %v181_v50 = vmul.f32 %v176_v43, %v86_v3  ;;  %v182_v51 = vmul.f32 %v176_v43, %v87_v9 }
  0xe6   :  { %v258_v44 = vpop.eup %257 }
  0xe7   :  { %v186_v45 = vrot.slane %v258_v44, 1  ;;  %v189_v46 = vmul.f32 %v258_v44, %v117_v4  ;;  %v190_v47 = vmul.f32 %v258_v44, %v118_v5 }
  0xe9   :  { %v191_v52 = vmul.f32 %v186_v45, %v119_v6  ;;  %v192_v53 = vmul.f32 %v186_v45, %v120_v7  ;;  %v193_v54 = vsub.f32 %v179_v48, %v189_v46  ;;  %v194_v55 = vsub.f32 %v180_v49, %v190_v47 }
  0xeb   :  { %v195_v56 = vsub.f32 %v181_v50, %v191_v52  ;;  %v196_v57 = vsub.f32 %v182_v51, %v192_v53  ;;  %v197_v60 = vmul.f32 %v193_v54, %v193_v54  ;;  %v198_v61 = vmul.f32 %v194_v55, %v194_v55 }
  0xed   :  { %v199_v58 = vmul.f32 %v195_v56, %v195_v56  ;;  %v200_v59 = vmul.f32 %v196_v57, %v196_v57 }
  0xef   :  { %v205_v62 = vrot.slane %v199_v58, 7  ;;  %v207_v63 = vrot.slane %v200_v59, 7 }
  0xf1   :  { %v206_v0 = vsel %vm129_vm1, %v205_v62, %v197_v60  ;;  %v208_v1 = vsel %vm129_vm1, %v207_v63, %v198_v61 }
  0xf2   :  { %v211_v2 = vsel %vm134_vm2, %v206_v0, 0.0  ;;  %v212_v3 = vsel %vm134_vm2, %v208_v1, 0.0 }
  0xf3   :  { %v213_v4 = vadd.f32 %v212_v3, %v211_v2 }
  0xf5   :  { %214 = vadd.xlane.f32.xlu1 %v213_v4 }
 0x17e   :  { %v215_v5 = vpop.xlane.xlu1 %214 }
 0x17f   :  { %v216_v6 = vrot.slane %v215_v5, 4 }
 0x181   :  { %v217_v7 = vadd.f32 %v216_v6, %v215_v5 }
 0x183   :  { %v218_v8 = vrot.slane %v217_v7, 2 }
 0x185   :  { %v219_v9 = vadd.f32 %v218_v8, %v217_v7 }
 0x187   :  { %v220_v10 = vrot.slane %v219_v9, 1 }
 0x189   :  { %v221_v11 = vadd.f32 %v220_v10, %v219_v9 }
 0x18b   :  { %242 = vpush %v221_v11 }
 0x1bc   :  { %s243_s23 = spop %242 }
 0x1bd   :  { %v223_v12 = vstv %s243_s23 }
 0x1be   :  { %225 = vst [vmem:[#allocation7] sm:$0xff] %v223_v12 }
 0x1bf   :  { %310 = shalt.err (!%p307_p0)
}
 0x1c0   :  { %235 = dma.vmem_to_hbm [thread:$0]  %s233_s1, 128, %s374_s2, [#allocation4]  }
 0x1c1   :  { %323 = dma.done.wait [#allocation4], 128  }
 0x1c2   :  { %324 = vsyncadd [#allocation4], 4294967168 }
 0x1c3   :  { %239 = vsyncpa [#allocation3], 1 }
 0x1c4   :  { %240 = vsyncpa [#allocation6], 1 }
 0x1c5   :  { %241 = vsyncpa [#allocation4], 1 }

</bundles_post_ra>
